<compile_context>
chip_gen: v5e
topology: v5e:2x2
jax: 0.10.0
libtpu: 0.0.40
codegen_flags: <defaults>
</compile_context>

<pallas_src>
import functools
import math

import jax
import jax.numpy as jnp
from jax import lax
from jax.experimental import pallas as pl
from jax.experimental.pallas import tpu as pltpu


# ----------------------------------------------------------------------------
# Tiling helpers.
# ----------------------------------------------------------------------------
def _sublane_align(dtype):
    """Minimum second-to-last-dim tile multiple for a stored dtype."""
    itemsize = jnp.dtype(dtype).itemsize
    return {4: 8, 2: 16, 1: 32}.get(itemsize, 8)


def _pick_tile(dim, pref, align):
    """Largest tile <= pref that divides `dim` and is a multiple of `align`,
    else the full dim (always a legal BlockSpec block)."""
    if dim <= pref:
        return dim
    t = pref - (pref % align) if pref >= align else align
    while t >= align:
        if dim % t == 0:
            return t
        t -= align
    return dim  # fall back to one full-size block


# ----------------------------------------------------------------------------
# Kernels 1 & 3: tiled linear layer  y = x @ W + b  with f32 accumulator.
# ----------------------------------------------------------------------------
def _linear_kernel(x_ref, w_ref, b_ref, o_ref, acc_ref, *, mxu_dtype):
    @pl.when(pl.program_id(2) == 0)
    def _():
        acc_ref[...] = jnp.zeros_like(acc_ref)

    acc_ref[...] += jnp.dot(
        x_ref[...].astype(mxu_dtype),
        w_ref[...].astype(mxu_dtype),
        preferred_element_type=jnp.float32,
    )

    @pl.when(pl.program_id(2) == pl.num_programs(2) - 1)
    def _():
        o_ref[...] = (acc_ref[...] + b_ref[...].astype(jnp.float32)).astype(o_ref.dtype)


def linear(x, w, b, *, mxu_dtype=jnp.bfloat16, tm=256, tn=256, tk=512):
    """x: (M, K), w: (K, N), b: (1, N) -> (M, N).

    mxu_dtype=bfloat16 runs the MXU at its native bf16 rate on v6e/v7x (f32
    accumulation kept); it does NOT reduce HBM traffic unless the arrays are
    stored bf16.  Use mxu_dtype=float32 for strict parity with the torch ref.
    """
    M, K = x.shape
    K2, N = w.shape
    assert K == K2 and b.shape == (1, N)
    sub = _sublane_align(x.dtype)
    tm = _pick_tile(M, tm, sub)     # sublane dim of x / out blocks
    tn = _pick_tile(N, tn, 128)     # lane dim (256-pref feeds the 256-wide MXU)
    tk = _pick_tile(K, tk, 128)     # lane dim of x block / sublane dim of w block
    grid = (M // tm, N // tn, K // tk)
    kern = functools.partial(_linear_kernel, mxu_dtype=mxu_dtype)
    return pl.pallas_call(
        kern,
        out_shape=jax.ShapeDtypeStruct((M, N), x.dtype),
        grid_spec=pltpu.PrefetchScalarGridSpec(
            num_scalar_prefetch=0,
            grid=grid,
            in_specs=[
                pl.BlockSpec((tm, tk), lambda i, j, k: (i, k)),
                pl.BlockSpec((tk, tn), lambda i, j, k: (k, j)),
                pl.BlockSpec((1, tn), lambda i, j, k: (0, j)),
            ],
            out_specs=pl.BlockSpec((tm, tn), lambda i, j, k: (i, j)),
            scratch_shapes=[pltpu.VMEM((tm, tn), jnp.float32)],
        ),
        compiler_params=pltpu.CompilerParams(
            dimension_semantics=("parallel", "parallel", "arbitrary")
        ),
    )(x, w, b)


# ----------------------------------------------------------------------------
# Kernel 2: flash-style tiled scaled-dot-product attention with online softmax.
# ----------------------------------------------------------------------------
def _flash_attention_kernel(
    q_ref, k_ref, v_ref, o_ref, m_sc, l_sc, acc_sc,
    *, scale, masked, mxu_dtype, tq, tkv
):
    qi = pl.program_id(1)
    kv = pl.program_id(2)

    @pl.when(kv == 0)
    def _():
        m_sc[...] = jnp.full_like(m_sc, -jnp.inf)
        l_sc[...] = jnp.zeros_like(l_sc)
        acc_sc[...] = jnp.zeros_like(acc_sc)

    def compute():
        q = (q_ref[0] * scale).astype(mxu_dtype)   # (tq, d); scale folded into Q
        k = k_ref[0].astype(mxu_dtype)             # (tkv, d)
        # Q K^T as a contraction over the last dim (no transposed copy of K).
        s = lax.dot_general(
            q, k, (((1,), (1,)), ((), ())), preferred_element_type=jnp.float32
        )                                          # (tq, tkv)
        if masked:
            row = qi * tq + lax.broadcasted_iota(jnp.int32, s.shape, 0)
            col = kv * tkv + lax.broadcasted_iota(jnp.int32, s.shape, 1)
            # Large finite negative instead of -inf: identical softmax for the
            # causal case, avoids inf-inf NaN corner cases.
            s = jnp.where(col > row, -1e30, s)

        m_prev = m_sc[...]
        m_new = jnp.maximum(m_prev, jnp.max(s, axis=-1, keepdims=True))
        alpha = jnp.exp(m_prev - m_new)            # EUP
        p = jnp.exp(s - m_new)                     # EUP (the real hot unit here)
        l_sc[...] = alpha * l_sc[...] + jnp.sum(p, axis=-1, keepdims=True)
        acc_sc[...] = alpha * acc_sc[...] + jnp.dot(
            p.astype(mxu_dtype), v_ref[0].astype(mxu_dtype),
            preferred_element_type=jnp.float32,
        )
        m_sc[...] = m_new

    if masked:
        # Causal tile skipping: a kv tile whose first column lies beyond the
        # last query row of this q tile contributes nothing.
        @pl.when(kv * tkv <= qi * tq + (tq - 1))
        def _():
            compute()
    else:
        compute()

    @pl.when(kv == pl.num_programs(2) - 1)
    def _():
        # Softmax denominator on the (otherwise idle) EUP reciprocal slot.
        o_ref[0] = (
            acc_sc[...] * pl.reciprocal(l_sc[...], approx=True)
        ).astype(o_ref.dtype)
        # TODO(synk): lane-dense (tq/nh, nh*edim) regrouped store when
        #   sql % nh == 0 would also delete the ctx-side XLA relayout.


def flash_attention(q, k, v, *, masked, mxu_dtype=jnp.bfloat16,
                    tq_pref=256, tkv_pref=512):
    """q, k, v: (B, S, D) with B = batch*heads -> (B, S, D)."""
    B, S, D = q.shape
    sub = _sublane_align(q.dtype)
    # Tile budget keeps the per-step working set (blocks double-buffered +
    # (tq, tkv) scores + scratch) at a few MiB -> fits the 32 MiB scoped-VMEM
    # default on v5e/v6e and v7x's halved physical VMEM.
    tq = _pick_tile(S, tq_pref, sub)
    tkv = _pick_tile(S, tkv_pref, sub)
    scale = 1.0 / math.sqrt(D)
    kern = functools.partial(
        _flash_attention_kernel,
        scale=scale, masked=masked, mxu_dtype=mxu_dtype, tq=tq, tkv=tkv,
    )
    return pl.pallas_call(
        kern,
        out_shape=jax.ShapeDtypeStruct((B, S, D), q.dtype),
        grid_spec=pltpu.PrefetchScalarGridSpec(
            num_scalar_prefetch=0,
            grid=(B, S // tq, S // tkv),
            in_specs=[
                pl.BlockSpec((1, tq, D), lambda b, i, j: (b, i, 0)),
                pl.BlockSpec((1, tkv, D), lambda b, i, j: (b, j, 0)),
                pl.BlockSpec((1, tkv, D), lambda b, i, j: (b, j, 0)),
            ],
            out_specs=pl.BlockSpec((1, tq, D), lambda b, i, j: (b, i, 0)),
            scratch_shapes=[
                pltpu.VMEM((tq, 1), jnp.float32),   # running max
                pltpu.VMEM((tq, 1), jnp.float32),   # running sum
                pltpu.VMEM((tq, D), jnp.float32),   # accumulator
            ],
        ),
        compiler_params=pltpu.CompilerParams(
            dimension_semantics=("parallel", "parallel", "arbitrary")
        ),
    )(q, k, v)


# ----------------------------------------------------------------------------
# Full AttentionHead forward pass.
# ----------------------------------------------------------------------------
def attention_head_forward(
    x, params, *, num_heads, embedding_dim, masked=False, mxu_dtype=jnp.bfloat16
):
    """x: (bs, sql, edim) -> (bs, sql, edim).

    mxu_dtype=bfloat16 (default) uses the bf16-native MXU on v6e/v7x with f32
    accumulation and f32 softmax math; pass float32 for strict torch parity.
    """
    bs, sql, edim = x.shape
    assert edim == embedding_dim
    w_att, b_att, w_out, b_out = params
    he = num_heads * embedding_dim

    # projections = self.w_attention(x)   (fused QKV projection, lane-dense N)
    proj = linear(x.reshape(bs * sql, edim), w_att, b_att, mxu_dtype=mxu_dtype)
    proj = proj.reshape(bs, sql, 3 * he)

    # torch.split(..., nh*edim, dim=-1) -> Q, K, V
    Qf, Kf, Vf = proj[..., :he], proj[..., he : 2 * he], proj[..., 2 * he :]

    # .contiguous().view((-1, nh, sql, edim)) == RAW row-major reshape (see
    # module-level TODO); (bs, nh, sql, edim) and (bs*nh, sql, edim) share the
    # same flat order, so we go straight to the flattened batch*head layout.
    Q = Qf.reshape(bs * num_heads, sql, edim)
    K = Kf.reshape(bs * num_heads, sql, edim)
    V = Vf.reshape(bs * num_heads, sql, edim)

    ctx = flash_attention(Q, K, V, masked=masked, mxu_dtype=mxu_dtype)

    # .contiguous().view((-1, sql, nh*edim)) == RAW reshape back.
    ctx = ctx.reshape(bs * sql, he)

    # output = self.w_output(output)
    out = linear(ctx, w_out, b_out, mxu_dtype=mxu_dtype)
    return out.reshape(bs, sql, edim)


# ----------------------------------------------------------------------------
# Deterministic parameter initialization (shapes from __init__).
# ----------------------------------------------------------------------------
def init_params(key, num_heads, embedding_dim, dtype=jnp.float32):
    k1, k2, k3, k4 = jax.random.split(key, 4)
    in1, out1 = embedding_dim, num_heads * 3 * embedding_dim
    in2, out2 = num_heads * embedding_dim, embedding_dim
    w_att = jax.random.normal(k1, (in1, out1), dtype) * 0.02
    b_att = jax.random.normal(k2, (1, out1), dtype) * 0.02
    w_out = jax.random.normal(k3, (in2, out2), dtype) * 0.02
    b_out = jax.random.normal(k4, (1, out2), dtype) * 0.02
    return (w_att, b_att, w_out, b_out)


# ----------------------------------------------------------------------------
# Pure-JAX reference (mirrors the PyTorch module) for a silent sanity check.
# ----------------------------------------------------------------------------
def _reference_forward(x, params, *, num_heads, embedding_dim, masked):
    w_att, b_att, w_out, b_out = params
    bs, sql, edim = x.shape
    he = num_heads * edim
    proj = jnp.einsum("bse,eo->bso", x, w_att, precision="highest") + b_att[0]
    Q, K, V = proj[..., :he], proj[..., he : 2 * he], proj[..., 2 * he :]
    Q = Q.reshape(bs, num_heads, sql, edim)   # raw reshape, matches .view
    K = K.reshape(bs, num_heads, sql, edim)
    V = V.reshape(bs, num_heads, sql, edim)
    s = jnp.einsum("bhqd,bhkd->bhqk", Q, K, precision="highest") / math.sqrt(edim)
    if masked:
        s = s + jnp.triu(jnp.full((sql, sql), -jnp.inf, jnp.float32), 1)
    p = jax.nn.softmax(s, axis=-1)
    ctx = jnp.einsum("bhqk,bhkd->bhqd", p, V, precision="highest")
    ctx = ctx.reshape(bs, sql, he)
    return jnp.einsum("bsf,fo->bso", ctx, w_out, precision="highest") + b_out[0]


if __name__ == "__main__":
    num_heads = 4
    embedding_dim = 32
    batch_size = 2
    seq_len = 8

    key = jax.random.PRNGKey(0)
    kx, kp = jax.random.split(key)
    x = jax.random.normal(kx, (batch_size, seq_len, embedding_dim), jnp.float32)
    params = init_params(kp, num_heads, embedding_dim)

    for masked in (False, True):
        ref = _reference_forward(
            x, params, num_heads=num_heads, embedding_dim=embedding_dim,
            masked=masked,
        )

        # Strict-parity path (f32 MXU operands).
        fwd_f32 = jax.jit(
            functools.partial(
                attention_head_forward, num_heads=num_heads,
                embedding_dim=embedding_dim, masked=masked,
                mxu_dtype=jnp.float32,
            )
        )
        out = fwd_f32(x, params)
        jax.block_until_ready(out)
        assert out.shape == (batch_size, seq_len, embedding_dim)
        assert jnp.allclose(out, ref, atol=2e-3, rtol=2e-2), (
            masked, float(jnp.max(jnp.abs(out - ref))))

        # Default fast path (bf16 MXU operands, f32 accumulation/softmax).
        fwd_bf16 = jax.jit(
            functools.partial(
                attention_head_forward, num_heads=num_heads,
                embedding_dim=embedding_dim, masked=masked,
            )
        )
        out_bf = fwd_bf16(x, params)
        jax.block_until_ready(out_bf)
        assert out_bf.shape == (batch_size, seq_len, embedding_dim)
        assert jnp.allclose(out_bf, ref, atol=3e-2, rtol=5e-2), (
            masked, float(jnp.max(jnp.abs(out_bf - ref))))

    print("KERNEL_OK")
</pallas_src>

<mosaic_0001>
module attributes {stable_mosaic.version = 11 : i64} {
  func.func @_linear_kernel(%arg0: i32, %arg1: i32, %arg2: i32, %arg3: memref<16x32xf32, #tpu.memory_space<vmem>>, %arg4: memref<32x128xf32, #tpu.memory_space<vmem>>, %arg5: memref<1x128xf32, #tpu.memory_space<vmem>>, %arg6: memref<16x128xf32, #tpu.memory_space<vmem>>, %arg7: memref<16x128xf32, #tpu.memory_space<vmem>>) attributes {dimension_semantics = [#tpu.dimension_semantics<parallel>, #tpu.dimension_semantics<parallel>, #tpu.dimension_semantics<arbitrary>], iteration_bounds = array<i64: 1, 3, 1>, scalar_prefetch = 0 : i64, scratch_operands = 1 : i64, tpu.core_type = #tpu.core_type<tc>, window_params = [{transform_indices = @transform_0, window_bounds = array<i64: 16, 32>}, {transform_indices = @transform_1, window_bounds = array<i64: 32, 128>}, {transform_indices = @transform_2, window_bounds = array<i64: 1, 128>}, {transform_indices = @transform_3, window_bounds = array<i64: 16, 128>}]} {
    %c0_i32 = arith.constant 0 : i32
    %0 = arith.cmpi eq, %arg2, %c0_i32 : i32
    %1 = arith.extui %0 : i1 to i32
    %c0_i32_0 = arith.constant 0 : i32
    %2 = arith.cmpi ne, %1, %c0_i32_0 : i32
    scf.if %2 {
      %cst_10 = arith.constant 0.000000e+00 : f32
      %12 = vector.broadcast %cst_10 : f32 to vector<16x128xf32>
      %c0_11 = arith.constant 0 : index
      %c0_12 = arith.constant 0 : index
      %13 = vector.load %arg7[%c0_11, %c0_12] : memref<16x128xf32, #tpu.memory_space<vmem>>, vector<16x128xf32>
      tpu.vector_store %arg7[%c0_11, %c0_12], %12 {strides = array<i32>} : memref<16x128xf32, #tpu.memory_space<vmem>>, vector<16x128xf32>,
    } else {
    }
    %c0 = arith.constant 0 : index
    %c0_1 = arith.constant 0 : index
    %3 = vector.load %arg7[%c0, %c0_1] : memref<16x128xf32, #tpu.memory_space<vmem>>, vector<16x128xf32>
    %c0_2 = arith.constant 0 : index
    %c0_3 = arith.constant 0 : index
    %4 = vector.load %arg3[%c0_2, %c0_3] : memref<16x32xf32, #tpu.memory_space<vmem>>, vector<16x32xf32>
    %c0_4 = arith.constant 0 : index
    %c0_5 = arith.constant 0 : index
    %5 = vector.load %arg4[%c0_4, %c0_5] : memref<32x128xf32, #tpu.memory_space<vmem>>, vector<32x128xf32>
    %cst = arith.constant dense<0.000000e+00> : vector<16x128xf32>
    %6 = tpu.matmul %4, %5, %cst {dimension_numbers = #tpu.dot_dimension_numbers<[1], [0], [0], [1], [0, 0, 1, 1], [], []>} : vector<16x32xf32>, vector<32x128xf32>, vector<16x128xf32> -> vector<16x128xf32>
    %7 = arith.addf %3, %6 : vector<16x128xf32>
    %c0_6 = arith.constant 0 : index
    %c0_7 = arith.constant 0 : index
    %8 = vector.load %arg7[%c0_6, %c0_7] : memref<16x128xf32, #tpu.memory_space<vmem>>, vector<16x128xf32>
    tpu.vector_store %arg7[%c0_6, %c0_7], %7 {strides = array<i32>} : memref<16x128xf32, #tpu.memory_space<vmem>>, vector<16x128xf32>,
    %c0_i32_8 = arith.constant 0 : i32
    %9 = arith.cmpi eq, %arg2, %c0_i32_8 : i32
    %10 = arith.extui %9 : i1 to i32
    %c0_i32_9 = arith.constant 0 : i32
    %11 = arith.cmpi ne, %10, %c0_i32_9 : i32
    scf.if %11 {
      %c0_10 = arith.constant 0 : index
      %c0_11 = arith.constant 0 : index
      %12 = vector.load %arg7[%c0_10, %c0_11] : memref<16x128xf32, #tpu.memory_space<vmem>>, vector<16x128xf32>
      %c0_12 = arith.constant 0 : index
      %c0_13 = arith.constant 0 : index
      %13 = vector.load %arg5[%c0_12, %c0_13] : memref<1x128xf32, #tpu.memory_space<vmem>>, vector<1x128xf32>
      %14 = vector.broadcast %13 : vector<1x128xf32> to vector<16x128xf32>
      %15 = arith.addf %12, %14 : vector<16x128xf32>
      %c0_14 = arith.constant 0 : index
      %c0_15 = arith.constant 0 : index
      %16 = vector.load %arg6[%c0_14, %c0_15] : memref<16x128xf32, #tpu.memory_space<vmem>>, vector<16x128xf32>
      tpu.vector_store %arg6[%c0_14, %c0_15], %15 {strides = array<i32>} : memref<16x128xf32, #tpu.memory_space<vmem>>, vector<16x128xf32>,
    } else {
    }
    return
  }
  func.func @transform_0(%arg0: i32, %arg1: i32, %arg2: i32) -> (i32, i32) {
    %c0_i32 = arith.constant 0 : i32
    return %arg0, %arg2 : i32, i32
  }
  func.func @transform_1(%arg0: i32, %arg1: i32, %arg2: i32) -> (i32, i32) {
    %c0_i32 = arith.constant 0 : i32
    return %arg2, %arg1 : i32, i32
  }
  func.func @transform_2(%arg0: i32, %arg1: i32, %arg2: i32) -> (i32, i32) {
    %c0_i32 = arith.constant 0 : i32
    %c0_i32_0 = arith.constant 0 : i32
    return %c0_i32, %arg1 : i32, i32
  }
  func.func @transform_3(%arg0: i32, %arg1: i32, %arg2: i32) -> (i32, i32) {
    %c0_i32 = arith.constant 0 : i32
    return %arg0, %arg1 : i32, i32
  }
}

module attributes {stable_mosaic.version = 11 : i64} {
  func.func @_flash_attention_kernel(%arg0: i32, %arg1: i32, %arg2: i32, %arg3: memref<1x8x32xf32, #tpu.memory_space<vmem>>, %arg4: memref<1x8x32xf32, #tpu.memory_space<vmem>>, %arg5: memref<1x8x32xf32, #tpu.memory_space<vmem>>, %arg6: memref<1x8x32xf32, #tpu.memory_space<vmem>>, %arg7: memref<8x1xf32, #tpu.memory_space<vmem>>, %arg8: memref<8x1xf32, #tpu.memory_space<vmem>>, %arg9: memref<8x32xf32, #tpu.memory_space<vmem>>) attributes {dimension_semantics = [#tpu.dimension_semantics<parallel>, #tpu.dimension_semantics<parallel>, #tpu.dimension_semantics<arbitrary>], iteration_bounds = array<i64: 8, 1, 1>, scalar_prefetch = 0 : i64, scratch_operands = 3 : i64, tpu.core_type = #tpu.core_type<tc>, window_params = [{transform_indices = @transform_0, window_bounds = array<i64: 1, 8, 32>}, {transform_indices = @transform_1, window_bounds = array<i64: 1, 8, 32>}, {transform_indices = @transform_2, window_bounds = array<i64: 1, 8, 32>}, {transform_indices = @transform_3, window_bounds = array<i64: 1, 8, 32>}]} {
    %c0_i32 = arith.constant 0 : i32
    %0 = arith.cmpi eq, %arg2, %c0_i32 : i32
    %1 = arith.extui %0 : i1 to i32
    %c0_i32_0 = arith.constant 0 : i32
    %2 = arith.cmpi ne, %1, %c0_i32_0 : i32
    scf.if %2 {
      %cst_27 = arith.constant 0xFF800000 : f32
      %37 = vector.broadcast %cst_27 : f32 to vector<8x1xf32>
      %c0_28 = arith.constant 0 : index
      %c0_29 = arith.constant 0 : index
      %38 = vector.load %arg7[%c0_28, %c0_29] : memref<8x1xf32, #tpu.memory_space<vmem>>, vector<8x1xf32>
      tpu.vector_store %arg7[%c0_28, %c0_29], %37 {strides = array<i32>} : memref<8x1xf32, #tpu.memory_space<vmem>>, vector<8x1xf32>,
      %cst_30 = arith.constant 0.000000e+00 : f32
      %39 = vector.broadcast %cst_30 : f32 to vector<8x1xf32>
      %c0_31 = arith.constant 0 : index
      %c0_32 = arith.constant 0 : index
      %40 = vector.load %arg8[%c0_31, %c0_32] : memref<8x1xf32, #tpu.memory_space<vmem>>, vector<8x1xf32>
      tpu.vector_store %arg8[%c0_31, %c0_32], %39 {strides = array<i32>} : memref<8x1xf32, #tpu.memory_space<vmem>>, vector<8x1xf32>,
      %cst_33 = arith.constant 0.000000e+00 : f32
      %41 = vector.broadcast %cst_33 : f32 to vector<8x32xf32>
      %c0_34 = arith.constant 0 : index
      %c0_35 = arith.constant 0 : index
      %42 = vector.load %arg9[%c0_34, %c0_35] : memref<8x32xf32, #tpu.memory_space<vmem>>, vector<8x32xf32>
      tpu.vector_store %arg9[%c0_34, %c0_35], %41 {strides = array<i32>} : memref<8x32xf32, #tpu.memory_space<vmem>>, vector<8x32xf32>,
    } else {
    }
    %c0 = arith.constant 0 : index
    %c0_1 = arith.constant 0 : index
    %c0_2 = arith.constant 0 : index
    %3 = vector.load %arg3[%c0, %c0_1, %c0_2] : memref<1x8x32xf32, #tpu.memory_space<vmem>>, vector<1x8x32xf32>
    %4 = vector.shape_cast %3 : vector<1x8x32xf32> to vector<8x32xf32>
    %cst = arith.constant 0.176776692 : f32
    %5 = vector.broadcast %cst : f32 to vector<8x32xf32>
    %6 = arith.mulf %4, %5 : vector<8x32xf32>
    %c0_3 = arith.constant 0 : index
    %c0_4 = arith.constant 0 : index
    %c0_5 = arith.constant 0 : index
    %7 = vector.load %arg4[%c0_3, %c0_4, %c0_5] : memref<1x8x32xf32, #tpu.memory_space<vmem>>, vector<1x8x32xf32>
    %8 = vector.shape_cast %7 : vector<1x8x32xf32> to vector<8x32xf32>
    %cst_6 = arith.constant dense<0.000000e+00> : vector<8x8xf32>
    %9 = tpu.matmul %6, %8, %cst_6 {dimension_numbers = #tpu.dot_dimension_numbers<[1], [1], [0], [0], [0, 0, 1, 0], [], []>} : vector<8x32xf32>, vector<8x32xf32>, vector<8x8xf32> -> vector<8x8xf32>
    %c0_7 = arith.constant 0 : index
    %c0_8 = arith.constant 0 : index
    %10 = vector.load %arg7[%c0_7, %c0_8] : memref<8x1xf32, #tpu.memory_space<vmem>>, vector<8x1xf32>
    %cst_9 = arith.constant dense<0xFF800000> : vector<8xf32>
    %11 = vector.multi_reduction <maximumf>, %9, %cst_9 [1] : vector<8x8xf32> to vector<8xf32>
    %12 = vector.shape_cast %11 : vector<8xf32> to vector<8x1xf32>
    %13 = arith.maximumf %10, %12 : vector<8x1xf32>
    %14 = arith.subf %10, %13 : vector<8x1xf32>
    %15 = math.exp %14 : vector<8x1xf32>
    %16 = vector.broadcast %13 : vector<8x1xf32> to vector<8x8xf32>
    %17 = arith.subf %9, %16 : vector<8x8xf32>
    %18 = math.exp %17 : vector<8x8xf32>
    %c0_10 = arith.constant 0 : index
    %c0_11 = arith.constant 0 : index
    %19 = vector.load %arg8[%c0_10, %c0_11] : memref<8x1xf32, #tpu.memory_space<vmem>>, vector<8x1xf32>
    %20 = arith.mulf %15, %19 : vector<8x1xf32>
    %cst_12 = arith.constant dense<0.000000e+00> : vector<8xf32>
    %21 = vector.multi_reduction <add>, %18, %cst_12 [1] : vector<8x8xf32> to vector<8xf32>
    %22 = vector.shape_cast %21 : vector<8xf32> to vector<8x1xf32>
    %23 = arith.addf %20, %22 : vector<8x1xf32>
    %c0_13 = arith.constant 0 : index
    %c0_14 = arith.constant 0 : index
    %24 = vector.load %arg8[%c0_13, %c0_14] : memref<8x1xf32, #tpu.memory_space<vmem>>, vector<8x1xf32>
    tpu.vector_store %arg8[%c0_13, %c0_14], %23 {strides = array<i32>} : memref<8x1xf32, #tpu.memory_space<vmem>>, vector<8x1xf32>,
    %c0_15 = arith.constant 0 : index
    %c0_16 = arith.constant 0 : index
    %25 = vector.load %arg9[%c0_15, %c0_16] : memref<8x32xf32, #tpu.memory_space<vmem>>, vector<8x32xf32>
    %26 = vector.broadcast %15 : vector<8x1xf32> to vector<8x32xf32>
    %27 = arith.mulf %26, %25 : vector<8x32xf32>
    %c0_17 = arith.constant 0 : index
    %c0_18 = arith.constant 0 : index
    %c0_19 = arith.constant 0 : index
    %28 = vector.load %arg5[%c0_17, %c0_18, %c0_19] : memref<1x8x32xf32, #tpu.memory_space<vmem>>, vector<1x8x32xf32>
    %29 = vector.shape_cast %28 : vector<1x8x32xf32> to vector<8x32xf32>
    %cst_20 = arith.constant dense<0.000000e+00> : vector<8x32xf32>
    %30 = tpu.matmul %18, %29, %cst_20 {dimension_numbers = #tpu.dot_dimension_numbers<[1], [0], [0], [1], [0, 0, 1, 1], [], []>} : vector<8x8xf32>, vector<8x32xf32>, vector<8x32xf32> -> vector<8x32xf32>
    %31 = arith.addf %27, %30 : vector<8x32xf32>
    %c0_21 = arith.constant 0 : index
    %c0_22 = arith.constant 0 : index
    %32 = vector.load %arg9[%c0_21, %c0_22] : memref<8x32xf32, #tpu.memory_space<vmem>>, vector<8x32xf32>
    tpu.vector_store %arg9[%c0_21, %c0_22], %31 {strides = array<i32>} : memref<8x32xf32, #tpu.memory_space<vmem>>, vector<8x32xf32>,
    %c0_23 = arith.constant 0 : index
    %c0_24 = arith.constant 0 : index
    %33 = vector.load %arg7[%c0_23, %c0_24] : memref<8x1xf32, #tpu.memory_space<vmem>>, vector<8x1xf32>
    tpu.vector_store %arg7[%c0_23, %c0_24], %13 {strides = array<i32>} : memref<8x1xf32, #tpu.memory_space<vmem>>, vector<8x1xf32>,
    %c0_i32_25 = arith.constant 0 : i32
    %34 = arith.cmpi eq, %arg2, %c0_i32_25 : i32
    %35 = arith.extui %34 : i1 to i32
    %c0_i32_26 = arith.constant 0 : i32
    %36 = arith.cmpi ne, %35, %c0_i32_26 : i32
    scf.if %36 {
      %c0_27 = arith.constant 0 : index
      %c0_28 = arith.constant 0 : index
      %37 = vector.load %arg9[%c0_27, %c0_28] : memref<8x32xf32, #tpu.memory_space<vmem>>, vector<8x32xf32>
      %c0_29 = arith.constant 0 : index
      %c0_30 = arith.constant 0 : index
      %38 = vector.load %arg8[%c0_29, %c0_30] : memref<8x1xf32, #tpu.memory_space<vmem>>, vector<8x1xf32>
      %39 = tpu.reciprocal %38 {approx = true} : vector<8x1xf32> -> vector<8x1xf32>
      %40 = vector.broadcast %39 : vector<8x1xf32> to vector<8x32xf32>
      %41 = arith.mulf %37, %40 : vector<8x32xf32>
      %c0_31 = arith.constant 0 : index
      %c0_32 = arith.constant 0 : index
      %c0_33 = arith.constant 0 : index
      %42 = vector.load %arg6[%c0_31, %c0_32, %c0_33] : memref<1x8x32xf32, #tpu.memory_space<vmem>>, vector<1x8x32xf32>
      %43 = vector.shape_cast %42 : vector<1x8x32xf32> to vector<8x32xf32>
      %44 = vector.shape_cast %41 : vector<8x32xf32> to vector<1x8x32xf32>
      tpu.vector_store %arg6[%c0_31, %c0_32, %c0_33], %44 {strides = array<i32>} : memref<1x8x32xf32, #tpu.memory_space<vmem>>, vector<1x8x32xf32>,
    } else {
    }
    return
  }
  func.func @transform_0(%arg0: i32, %arg1: i32, %arg2: i32) -> (i32, i32, i32) {
    %c0_i32 = arith.constant 0 : i32
    %c0_i32_0 = arith.constant 0 : i32
    return %arg0, %arg1, %c0_i32 : i32, i32, i32
  }
  func.func @transform_1(%arg0: i32, %arg1: i32, %arg2: i32) -> (i32, i32, i32) {
    %c0_i32 = arith.constant 0 : i32
    %c0_i32_0 = arith.constant 0 : i32
    return %arg0, %arg2, %c0_i32 : i32, i32, i32
  }
  func.func @transform_2(%arg0: i32, %arg1: i32, %arg2: i32) -> (i32, i32, i32) {
    %c0_i32 = arith.constant 0 : i32
    %c0_i32_0 = arith.constant 0 : i32
    return %arg0, %arg2, %c0_i32 : i32, i32, i32
  }
  func.func @transform_3(%arg0: i32, %arg1: i32, %arg2: i32) -> (i32, i32, i32) {
    %c0_i32 = arith.constant 0 : i32
    %c0_i32_0 = arith.constant 0 : i32
    return %arg0, %arg1, %c0_i32 : i32, i32, i32
  }
}

module attributes {stable_mosaic.version = 11 : i64} {
  func.func @_linear_kernel(%arg0: i32, %arg1: i32, %arg2: i32, %arg3: memref<16x128xf32, #tpu.memory_space<vmem>>, %arg4: memref<128x32xf32, #tpu.memory_space<vmem>>, %arg5: memref<1x32xf32, #tpu.memory_space<vmem>>, %arg6: memref<16x32xf32, #tpu.memory_space<vmem>>, %arg7: memref<16x32xf32, #tpu.memory_space<vmem>>) attributes {dimension_semantics = [#tpu.dimension_semantics<parallel>, #tpu.dimension_semantics<parallel>, #tpu.dimension_semantics<arbitrary>], iteration_bounds = array<i64: 1, 1, 1>, scalar_prefetch = 0 : i64, scratch_operands = 1 : i64, tpu.core_type = #tpu.core_type<tc>, window_params = [{transform_indices = @transform_0, window_bounds = array<i64: 16, 128>}, {transform_indices = @transform_1, window_bounds = array<i64: 128, 32>}, {transform_indices = @transform_2, window_bounds = array<i64: 1, 32>}, {transform_indices = @transform_3, window_bounds = array<i64: 16, 32>}]} {
    %c0_i32 = arith.constant 0 : i32
    %0 = arith.cmpi eq, %arg2, %c0_i32 : i32
    %1 = arith.extui %0 : i1 to i32
    %c0_i32_0 = arith.constant 0 : i32
    %2 = arith.cmpi ne, %1, %c0_i32_0 : i32
    scf.if %2 {
      %cst_10 = arith.constant 0.000000e+00 : f32
      %12 = vector.broadcast %cst_10 : f32 to vector<16x32xf32>
      %c0_11 = arith.constant 0 : index
      %c0_12 = arith.constant 0 : index
      %13 = vector.load %arg7[%c0_11, %c0_12] : memref<16x32xf32, #tpu.memory_space<vmem>>, vector<16x32xf32>
      tpu.vector_store %arg7[%c0_11, %c0_12], %12 {strides = array<i32>} : memref<16x32xf32, #tpu.memory_space<vmem>>, vector<16x32xf32>,
    } else {
    }
    %c0 = arith.constant 0 : index
    %c0_1 = arith.constant 0 : index
    %3 = vector.load %arg7[%c0, %c0_1] : memref<16x32xf32, #tpu.memory_space<vmem>>, vector<16x32xf32>
    %c0_2 = arith.constant 0 : index
    %c0_3 = arith.constant 0 : index
    %4 = vector.load %arg3[%c0_2, %c0_3] : memref<16x128xf32, #tpu.memory_space<vmem>>, vector<16x128xf32>
    %c0_4 = arith.constant 0 : index
    %c0_5 = arith.constant 0 : index
    %5 = vector.load %arg4[%c0_4, %c0_5] : memref<128x32xf32, #tpu.memory_space<vmem>>, vector<128x32xf32>
    %cst = arith.constant dense<0.000000e+00> : vector<16x32xf32>
    %6 = tpu.matmul %4, %5, %cst {dimension_numbers = #tpu.dot_dimension_numbers<[1], [0], [0], [1], [0, 0, 1, 1], [], []>} : vector<16x128xf32>, vector<128x32xf32>, vector<16x32xf32> -> vector<16x32xf32>
    %7 = arith.addf %3, %6 : vector<16x32xf32>
    %c0_6 = arith.constant 0 : index
    %c0_7 = arith.constant 0 : index
    %8 = vector.load %arg7[%c0_6, %c0_7] : memref<16x32xf32, #tpu.memory_space<vmem>>, vector<16x32xf32>
    tpu.vector_store %arg7[%c0_6, %c0_7], %7 {strides = array<i32>} : memref<16x32xf32, #tpu.memory_space<vmem>>, vector<16x32xf32>,
    %c0_i32_8 = arith.constant 0 : i32
    %9 = arith.cmpi eq, %arg2, %c0_i32_8 : i32
    %10 = arith.extui %9 : i1 to i32
    %c0_i32_9 = arith.constant 0 : i32
    %11 = arith.cmpi ne, %10, %c0_i32_9 : i32
    scf.if %11 {
      %c0_10 = arith.constant 0 : index
      %c0_11 = arith.constant 0 : index
      %12 = vector.load %arg7[%c0_10, %c0_11] : memref<16x32xf32, #tpu.memory_space<vmem>>, vector<16x32xf32>
      %c0_12 = arith.constant 0 : index
      %c0_13 = arith.constant 0 : index
      %13 = vector.load %arg5[%c0_12, %c0_13] : memref<1x32xf32, #tpu.memory_space<vmem>>, vector<1x32xf32>
      %14 = vector.broadcast %13 : vector<1x32xf32> to vector<16x32xf32>
      %15 = arith.addf %12, %14 : vector<16x32xf32>
      %c0_14 = arith.constant 0 : index
      %c0_15 = arith.constant 0 : index
      %16 = vector.load %arg6[%c0_14, %c0_15] : memref<16x32xf32, #tpu.memory_space<vmem>>, vector<16x32xf32>
      tpu.vector_store %arg6[%c0_14, %c0_15], %15 {strides = array<i32>} : memref<16x32xf32, #tpu.memory_space<vmem>>, vector<16x32xf32>,
    } else {
    }
    return
  }
  func.func @transform_0(%arg0: i32, %arg1: i32, %arg2: i32) -> (i32, i32) {
    %c0_i32 = arith.constant 0 : i32
    return %arg0, %arg2 : i32, i32
  }
  func.func @transform_1(%arg0: i32, %arg1: i32, %arg2: i32) -> (i32, i32) {
    %c0_i32 = arith.constant 0 : i32
    return %arg2, %arg1 : i32, i32
  }
  func.func @transform_2(%arg0: i32, %arg1: i32, %arg2: i32) -> (i32, i32) {
    %c0_i32 = arith.constant 0 : i32
    %c0_i32_0 = arith.constant 0 : i32
    return %c0_i32, %arg1 : i32, i32
  }
  func.func @transform_3(%arg0: i32, %arg1: i32, %arg2: i32) -> (i32, i32) {
    %c0_i32 = arith.constant 0 : i32
    return %arg0, %arg1 : i32, i32
  }
}

</mosaic_0001>

<bundles_post_ra>
// kernel: attention_head_forward.4
= control target key start
LH: loop header
LB: loop body
LE: loop exit
PB: predicated region body
PF: predicated region fallthrough
CT: control target
= control target key end

     0   :  { %s575_s12 = smov 0   ;;  %s577_s13 = smov 0   ;;  %s632_s0 = inlined_call_operand.vmem [shape: f32[8,8,32], index: 0, kind: input, shape index: {}]   ;;  %s633_s1 = inlined_call_operand.vmem [shape: f32[8,8,32], index: 1, kind: input, shape index: {}]   ;;  %s634_s2 = inlined_call_operand.vmem [shape: f32[8,8,32], index: 2, kind: input, shape index: {}]   ;;  %s635_s3 = inlined_call_operand.vmem [shape: f32[8,8,32], index: 3, kind: output, shape index: {}]  }
   0x1   :  { %s579_s14 = smov 0  }
   0x2 LB: > { %s32_s15 = sadd.s32 1, %s546_s13  ;;  %p482_p0 = scmp.ge.s32.totalorder %s550_s14, 1  ;;  %s550_s14 = sphi %s579_s14, %s13_s14   ;;  %s546_s13 = sphi %s577_s13, %s637_s13   ;;  %s542_s12 = sphi %s575_s12, %s636_s12  }
   0x3   : > { %p34_p1 = scmp.ge.s32.totalorder %s32_s15, 8  ;;  %p190_p2 = scmp.lt.s32.totalorder %s550_s14, 9 }
   0x5   : > { %s639_s15 = smov (%p34_p1, %s32_s15), 0  ;;  %p191_p3 = pnand %p482_p0, %p190_p2 }
   0x6   : > { %p232_p4 = scmp.lt.s32.totalorder (!%p191_p3), %s542_s12, 7 }
   0x7   : > { %194 = sbr.rel (%p191_p3) target bundleno = 618 (0x26a), region = 32 }
   0xc   : > { %s641_s12 = smov (!%p232_p4, %s542_s12), 7  ;;  %vm267_vm0 = vcmask 261120   ;;  %vm264_vm1 = vcmask 7168   ;;  %v552_v3 = vmov -inf   ;;  %vm300_vm2 = vcmask 64512  }
   0xd   : > { %s593_s16 = sshll.u32 %s641_s12, 3  ;;  %265 = vst.msk [vmem:[#allocation2] sm:$0xff] %vm264_vm1, %v552_v3  ;;  %v553_v6 = vmov 0   ;;  %v554_v7 = vmov 0.0  }
   0xe   : > { %s245_s19 = scalar_lea.vmem %s633_s1, %s593_s16  ;;  %s238_s22 = scalar_lea.vmem %s632_s0, %s593_s16  ;;  %519 = vset.pattern.permute.xlu0 %v553_v6  ;;  %520 = vset.pattern.permute.xlu1 %v553_v6  ;;  %266 = vst.msk [vmem:[#allocation3] sm:$0xff] %vm264_vm1, %v554_v7 }
   0xf   : > { %v271_v0 = vld [vmem:[%s245_s19] sm:$0xff]  ;;  %521 = vset.pattern.permute.xlu2 %v553_v6  ;;  %268 = vst.msk [vmem:[#allocation4] sm:$0xff] %vm267_vm0, %v554_v7  ;;  %s252_s25 = scalar_lea.vmem %s634_s2, %s593_s16  ;;  %s259_s28 = scalar_lea.vmem %s635_s3, %s593_s16 }
  0x10   : > { %v269_v1 = vld [vmem:[%s238_s22] sm:$0xff]  ;;  %487 = vmatpush.xpose.msk.msra.mxu0 %vm267_vm0, %v271_v0 }
  0x11   : > { %v270_v2 = vmul.f32 0.17677669, %v269_v1  ;;  %v331_v12 = vld [vmem:[%s252_s25] sm:$0xff] }
  0x12   : > { %350 = vmatpush.msra.mxu1 %v331_v12 }
  0x13   : > { %488 = vmatmul.msk.f32.vlgmr.msra.gmra.mxu0 %vm267_vm0, %v270_v2 }
  0x14   : > { %v299_v8 = vld [vmem:[#allocation2] sm:$0xff] }
  0x15   : > { %v316_v20 = vld [vmem:[#allocation3] sm:$0xff] }
  0x16   : > { %v324_v26 = vld [vmem:[#allocation4] sm:$0xff] }
  0x90   : > { %v296_v4 = vpop.f32.mrf.mxu0 }
  0x91   : > { %v301_v5 = vsel %vm300_vm2, %v296_v4, -inf }
  0x92   : > { %302 = vmax.xlane.f32.xlu0 %v301_v5 }
 0x105   : > { %v303_v9 = vpop.xlane.xlu0 %302 }
 0x106   : > { %v304_v10 = vmax.f32 %v299_v8, %v303_v9 }
 0x108   : > { %v305_v11 = vsub.f32 %v299_v8, %v304_v10  ;;  %357 = vst.msk [vmem:[#allocation2] sm:$0xff] %vm264_vm1, %v304_v10  ;;  %310 = vperm.xlu0 %519, %v304_v10  }
 0x10a   : > { %v306_v18 = vmul.f32 1.442695, %v305_v11 }
 0x17a   : > { %v311_v13 = vpop.permute.xlu0 %310 }
 0x17b   : > { %v313_v14 = vsub.f32 %v296_v4, %v311_v13 }
 0x17d   : > { %v314_v15 = vmul.f32 1.442695, %v313_v14 }
 0x17f   : > { %522 = vpow2.f32 %v314_v15 }
 0x180   : > { %524 = vpow2.f32 %v306_v18 }
 0x185   : > { %v523_v16 = vpop.eup %522 }
 0x186   : > { %489 = vmatmul.msk.f32.vlgmr.msra.gmra.mxu1 %vm300_vm2, %v523_v16  ;;  %v318_v17 = vsel %vm300_vm2, %v523_v16, 0.0  ;;  %v525_v19 = vpop.eup %524 }
 0x187   : > { %319 = vadd.xlane.f32.xlu1 %v318_v17  ;;  %v317_v21 = vmul.f32 %v525_v19, %v316_v20 }
 0x1a0   : > { %327 = vperm.xlu1 %520, %v525_v19  }
 0x1fa   : > { %v320_v22 = vpop.xlane.xlu1 %319 }
 0x1fb   : > { %v321_v23 = vadd.f32 %v320_v22, %v317_v21 }
 0x1fd   : > { %323 = vst.msk [vmem:[#allocation3] sm:$0xff] %vm264_vm1, %v321_v23 }
 0x203   : > { %v352_v29 = vpop.f32.mrf.mxu1 }
 0x204   : > { %v362_v24 = vld [vmem:[#allocation3] sm:$0xff] }
 0x205   : > { %526 = vrcp.f32 %v362_v24 }
 0x20b   : > { %v527_v25 = vpop.eup %526 }
 0x20c   : > { %366 = vperm.xlu2 %521, %v527_v25  }
 0x212   : > { %v328_v27 = vpop.permute.xlu1 %327 }
 0x213   : > { %v330_v28 = vmul.f32 %v328_v27, %v324_v26 }
 0x215   : > { %v355_v30 = vadd.f32 %v352_v29, %v330_v28 }
 0x217   : > { %356 = vst.msk [vmem:[#allocation4] sm:$0xff] %vm267_vm0, %v355_v30 }
 0x21e   : > { %v361_v31 = vld [vmem:[#allocation4] sm:$0xff] }
 0x266   : > { %v367_v32 = vpop.permute.xlu2 %366 }
 0x267   : > { %v369_v33 = vmul.f32 %v367_v32, %v361_v31 }
 0x269   : > { %370 = vst.msk [vmem:[%s259_s28] sm:$0xff] %vm267_vm0, %v369_v33 }
 0x26a PF: > { %s13_s14 = sadd.s32 1, %s550_s14   ;;  %s636_s12 = smov %s546_s13 }
 0x26b   : > { %p10_p5 = scmp.ge.s32.totalorder %s13_s14, 10   ;;  %s637_s13 = smov %s639_s15 }
 0x26d   :  { %12 = sbr.rel (!%p10_p5) target bundleno = 2 (0x2), region = 76 }

// kernel: attention_head_forward.3
= control target key start
LH: loop header
LB: loop body
LE: loop exit
PB: predicated region body
PF: predicated region fallthrough
CT: control target
= control target key end

     0   :  { %8 = vsyncpa [#allocation4], 0  ;;  %s912_s0 = inlined_call_operand.hbm [shape: f32[16,32], index: 0, kind: input, shape index: {}]   ;;  %s913_s1 = inlined_call_operand.hbm [shape: f32[32,384], index: 1, kind: input, shape index: {}]   ;;  %s914_s2 = inlined_call_operand.hbm [shape: f32[1,384], index: 2, kind: input, shape index: {}]   ;;  %s915_s3 = inlined_call_operand.vmem [shape: f32[16,384], index: 3, kind: output, shape index: {}]  }
   0x1   :  { %9 = vsyncpa [#allocation6], 0 }
   0x2   :  { %11 = vsyncpa [#allocation6 + $0x1], 0  ;;  %s760_s12 = smov 0   ;;  %s762_s13 = smov 0  }
   0x3   :  { %s764_s14 = smov 0   ;;  %s766_s15 = smov 0  }
   0x4   :  { %s768_s16 = smov 0   ;;  %s770_s17 = smov 0  }
   0x5 LB: > { %s32_s18 = sadd.s32 1, %s730_s16  ;;  %s73_s19 = sadd.s32 1, %s722_s14  ;;  %s734_s17 = sphi %s770_s17, %s17_s17   ;;  %s730_s16 = sphi %s768_s16, %s925_s16   ;;  %s726_s15 = sphi %s766_s15, %s924_s15   ;;  %s722_s14 = sphi %s764_s14, %s923_s14   ;;  %s718_s13 = sphi %s762_s13, %s922_s13   ;;  %s714_s12 = sphi %s760_s12, %s921_s12  }
   0x6   : > { %p34_p0 = scmp.ge.s32.totalorder %s32_s18, 3  ;;  %p80_p1 = scmp.ne.s32.totalorder %s722_s14, %s718_s13 }
   0x7   : > { %p81_p2 = scmp.eq.s32.totalorder %s734_s17, 0  ;;  %p535_p5 = scmp.lt.s32.totalorder %s734_s17, 3 }
   0x8   : > { %s927_s18 = smov (%p34_p0, %s32_s18), 0  ;;  %s182_s22 = sand.u32 1, %s734_s17  }
   0x9   : > { %p800_p3 = por %p81_p2, %p80_p1  ;;  %s69_s21 = ssub.s32 %s730_s16, %s927_s18 }
   0xa   : > { %p71_p4 = scmp.eq.s32.totalorder %s69_s21, 0  ;;  %s184_s23 = sand.u32 1, %s722_s14  }
   0xb   : > { %s499_s25 = sshll.u32 %s184_s23, 5  ;;  %s500_s26 = sshll.u32 %s730_s16, 3 }
   0xc   : > { %s810_s24 = scalar_select %p71_p4, %s722_s14, %s73_s19  }
   0xd   : > { %s193_s29 = scalar_lea.hbm %s913_s1, %s500_s26  ;;  %s186_s30 = scalar_lea.vmem [#allocation5], %s499_s25 }
   0xe   : > { %s196_s4 = sshll.u32 %s186_s30, 4  ;;  %s194_s5 = sshll.u32 %s193_s29, 4  ;;  %s197_s4 = int_to_ptr.vmem [resolvable:$true] %s196_s4  ;;  %s195_s5 = int_to_ptr.hbm [resolvable:$true] %s194_s5 }
   0xf   : > { %p820_p6 = pnand %p535_p5, %p800_p3  ;;  %s824_s7 = scalar_lea.sflag [#allocation6], %s182_s22 }
  0x10   : > { %s736_s8 = smov 384   ;;  %s737_s9 = smov 128  }
  0x11   : > { %s738_s10 = smov 8   ;;  %s830_s11 = sadd.s32 4294967295, %s734_s17  }
  0x12   : > { %530 = dma.hbm_to_vmem [thread:$0]  (!%p820_p6), %s195_s5, 512, %s197_s4, %s824_s7, %s736_s8, %s737_s9, %s738_s10  }
  0x13   : > { %p86_p7 = scmp.ne.s32.totalorder %s718_s13, %s714_s12  ;;  %p87_p8 = scmp.eq.s32.totalorder %s830_s11, 0 }
  0x14   : > { %p138_p9 = scmp.eq.s32.totalorder %s830_s11, 2  ;;  %p496_p10 = scmp.ge.s32.totalorder %s734_s17, 1 }
  0x15   : > { %p151_p11 = scmp.lt.s32.totalorder %s734_s17, 4  ;;  %p840_p12 = por %p87_p8, %p86_p7 }
  0x16   : > { %p847_p13 = por %p138_p9, %p80_p1  ;;  %s166_s25 = sshll.u32 %s912_s0, 4  ;;  %s167_s25 = int_to_ptr.hbm [resolvable:$true] %s166_s25 }
  0x17   : > { %p851_p0 = pnand %p496_p10, %p151_p11  ;;  %s739_s26 = smov [#allocation3]  }
  0x18   : > { %s168_s27 = sshll.u32 %s739_s26, 4  ;;  %s212_s30 = scalar_lea.hbm %s914_s2, %s730_s16  ;;  %s169_s27 = int_to_ptr.vmem [resolvable:$true] %s168_s27 }
  0x19   : > { %p523_p2 = pneg %p851_p0  ;;  %s209_s4 = scalar_lea.vmem [#allocation7], %s184_s23 }
  0x1a   : > { %s216_s5 = sshll.u32 %s209_s4, 4  ;;  %s214_s8 = sshll.u32 %s212_s30, 4  ;;  %s215_s8 = int_to_ptr.hbm [resolvable:$true] %s214_s8  ;;  %s217_s5 = int_to_ptr.vmem [resolvable:$true] %s216_s5 }
  0x1b   : > { %p524_p1 = pnand %p523_p2, %p87_p8  ;;  %225 = sbr.rel (%p851_p0) target bundleno = 183 (0xb7), region = 32 }
  0x1c   : > { %533 = dma.hbm_to_vmem [thread:$0]  (!%p820_p6), %s215_s8, 16, %s217_s5, %s824_s7  }
  0x1d   : > { %526 = dma.hbm_to_vmem [thread:$0]  (!%p524_p1), %s167_s25, 256, %s169_s27, [#allocation4], %s737_s9, %s737_s9, %s738_s10  }
  0x20   : > { %705 = dma.done.wait (%p87_p8), [#allocation4], 256  }
  0x21   : > { %707 = vsyncadd (%p87_p8), [#allocation4], 4294967040  ;;  %s232_s23 = sand.u32 1, %s830_s11   ;;  %s879_s12 = sand.u32 1, %s718_s13  }
  0x22   : > { %s503_s9 = sshll.u32 %s879_s12, 5  ;;  %s233_s10 = scalar_lea.sflag [#allocation6], %s232_s23 }
  0x23   : > { %s236_s6 = scalar_lea.vmem [#allocation5], %s503_s9 }
  0x24   : > { %709 = dma.done.wait (%p840_p12), %s233_s10, 528  }
  0x25   : > { %711 = vsyncadd (%p840_p12), %s233_s10, 4294966768  ;;  %v288_v0 = vld [vmem:[%s236_s6 + $0x18] sm:$0xff]  ;;  %v287_v1 = vld [vmem:[%s236_s6 + $0x10] sm:$0xff]  ;;  %s245_s7 = scalar_lea.vmem [#allocation7], %s879_s12  ;;  %vm289_vm0 = vcmask 261120   ;;  %s504_s11 = sshll.u32 %s879_s12, 4 }
  0x26   : > { %308 = vmatpush.msra.mxu0 %v288_v0  ;;  %511 = vmatpush.msra.mxu1 %v288_v0  ;;  %v286_v2 = vld [vmem:[%s236_s6 + $0x8] sm:$0xff]  ;;  %v285_v3 = vld [vmem:[%s236_s6] sm:$0xff]  ;;  %v283_v4 = vld [vmem:[#allocation3] sm:$0xff]  ;;  %s271_s19 = scalar_lea.vmem [#allocation8], %s504_s11  ;;  %s508_s21 = sshll.u32 (%p847_p13), %s726_s15, 3 }
  0x27   : > { %v284_v5 = vld [vmem:[#allocation3 + $0x8] sm:$0xff]  ;;  %v589_v6 = vld [vmem:[%s245_s7] ss:$0 sm:$0xff]  ;;  %s347_s26 = scalar_lea.vmem (%p847_p13), %s915_s3, %s508_s21 }
  0x28   : > { %309 = vmatpush.msra.mxu0 %v287_v1  ;;  %512 = vmatpush.msra.mxu1 %v287_v1 }
  0x2a   : > { %310 = vmatpush.msra.mxu0 %v286_v2  ;;  %513 = vmatpush.msra.mxu1 %v286_v2 }
  0x2c   : > { %311 = vmatpush.msra.mxu0 %v285_v3  ;;  %514 = vmatpush.msra.mxu1 %v285_v3 }
  0x2d   : > { %505 = vmatmul.msk.f32.vlgmr.msra.gmra.mxu0 %vm289_vm0, %v283_v4  ;;  %506 = vmatmul.msk.f32.vlgmr.msra.gmra.mxu1 %vm289_vm0, %v284_v5 }
  0xaa   : > { %v313_v7 = vpop.f32.mrf.mxu0  ;;  %v316_v8 = vpop.f32.mrf.mxu1  ;;  %342 = sbr.rel (!%p847_p13) target bundleno = 183 (0xb7), region = 56 }
  0xab   : > { %v332_v9 = vadd.f32 %v589_v6, %v313_v7  ;;  %v333_v10 = vadd.f32 %v589_v6, %v316_v8 }
  0xad   : > { %334 = vst [vmem:[%s271_s19] sm:$0xff] %v332_v9 }
  0xae   : > { %335 = vst [vmem:[%s271_s19 + $0x8] sm:$0xff] %v333_v10 }
  0xb4   : > { %v378_v11 = vld [vmem:[%s271_s19] sm:$0xff] }
  0xb5   : > { %v380_v12 = vld [vmem:[%s271_s19 + $0x8] sm:$0xff]  ;;  %379 = vst [vmem:[%s347_s26] sm:$0xff] %v378_v11 }
  0xb6   : > { %381 = vst [vmem:[%s347_s26 + $0x18] sm:$0xff] %v380_v12 }
  0xb7 PF: > { %s17_s17 = sadd.s32 1, %s734_s17   ;;  %s921_s12 = smov %s718_s13 }
  0xb8   : > { %p14_p3 = scmp.ge.s32.totalorder %s17_s17, 5   ;;  %s922_s13 = smov %s722_s14 }
  0xb9   : > { %s923_s14 = smov %s810_s24  ;;  %s924_s15 = smov %s730_s16 }
  0xba   : > { %s925_s16 = smov %s927_s18  ;;  %16 = sbr.rel (!%p14_p3) target bundleno = 5 (0x5), region = 135 }
  0xbf   :  { %397 = vsyncpa [#allocation4], 1 }
  0xc0   :  { %399 = vsyncpa [#allocation4 + $0x1], 1 }
  0xc1   :  { %400 = vsyncpa [#allocation6], 1 }
  0xc2   :  { %402 = vsyncpa [#allocation6 + $0x1], 1 }

// kernel: attention_head_forward.5
= control target key start
LH: loop header
LB: loop body
LE: loop exit
PB: predicated region body
PF: predicated region fallthrough
CT: control target
= control target key end

     0   :  { %vm19_vm0 = vcmask 261120   ;;  %v148_v2 = vmov 0.0   ;;  %s238_s0 = inlined_call_operand.vmem [shape: f32[16,128], index: 0, kind: input, shape index: {}]   ;;  %s239_s1 = inlined_call_operand.vmem [shape: f32[128,32], index: 1, kind: input, shape index: {}]   ;;  %s240_s2 = inlined_call_operand.vmem [shape: f32[1,32], index: 2, kind: input, shape index: {}]   ;;  %s241_s3 = inlined_call_operand.hbm [shape: f32[16,32], index: 3, kind: output, shape index: {}]  }
   0x1   :  { %v41_v0 = vld [vmem:[%s239_s1 + $0x78] sm:$0xff]  ;;  %v40_v1 = vld [vmem:[%s239_s1 + $0x70] sm:$0xff]  ;;  %20 = vst.msk [vmem:[#allocation2] sm:$0xff] %vm19_vm0, %v148_v2  ;;  %v39_v3 = vld [vmem:[%s239_s1 + $0x68] sm:$0xff] }
   0x2   :  { %42 = vmatpush.msra.mxu0 %v41_v0  ;;  %101 = vmatpush.msra.mxu1 %v41_v0  ;;  %21 = vst.msk [vmem:[#allocation2 + $0x8] sm:$0xff] %vm19_vm0, %v148_v2  ;;  %v38_v4 = vld [vmem:[%s239_s1 + $0x60] sm:$0xff]  ;;  %v37_v5 = vld [vmem:[%s239_s1 + $0x58] sm:$0xff] }
   0x4   :  { %43 = vmatpush.msra.mxu0 %v40_v1  ;;  %102 = vmatpush.msra.mxu1 %v40_v1 }
   0x6   :  { %44 = vmatpush.msra.mxu0 %v39_v3  ;;  %103 = vmatpush.msra.mxu1 %v39_v3 }
   0x7   :  { %8 = vsyncpa [#allocation4], 0  ;;  %v36_v6 = vld [vmem:[%s239_s1 + $0x50] sm:$0xff]  ;;  %v35_v7 = vld [vmem:[%s239_s1 + $0x48] sm:$0xff]  ;;  %s149_s22 = smov [#allocation3]   ;;  %s89_s25 = sshll.u32 %s241_s3, 4  ;;  %s90_s25 = int_to_ptr.hbm [resolvable:$true] %s89_s25 }
   0x8   :  { %45 = vmatpush.msra.mxu0 %v38_v4  ;;  %104 = vmatpush.msra.mxu1 %v38_v4  ;;  %v34_v8 = vld [vmem:[%s239_s1 + $0x40] sm:$0xff]  ;;  %v33_v9 = vld [vmem:[%s239_s1 + $0x38] sm:$0xff]  ;;  %v32_v10 = vld [vmem:[%s239_s1 + $0x30] sm:$0xff]  ;;  %s150_s26 = smov 128   ;;  %s151_s27 = smov 8  }
   0x9   :  { %v31_v11 = vld [vmem:[%s239_s1 + $0x28] sm:$0xff]  ;;  %v30_v12 = vld [vmem:[%s239_s1 + $0x20] sm:$0xff]  ;;  %v29_v13 = vld [vmem:[%s239_s1 + $0x18] sm:$0xff] }
   0xa   :  { %46 = vmatpush.msra.mxu0 %v37_v5  ;;  %105 = vmatpush.msra.mxu1 %v37_v5  ;;  %v28_v14 = vld [vmem:[%s239_s1 + $0x10] sm:$0xff]  ;;  %v27_v15 = vld [vmem:[%s239_s1 + $0x8] sm:$0xff]  ;;  %v26_v16 = vld [vmem:[%s239_s1] sm:$0xff] }
   0xb   :  { %v24_v17 = vld [vmem:[%s238_s0] sm:$0xff]  ;;  %v25_v18 = vld [vmem:[%s238_s0 + $0x8] sm:$0xff]  ;;  %s87_s0 = sshll.u32 %s149_s22, 4  ;;  %s88_s0 = int_to_ptr.vmem [resolvable:$true] %s87_s0 }
   0xc   :  { %47 = vmatpush.msra.mxu0 %v36_v6  ;;  %106 = vmatpush.msra.mxu1 %v36_v6  ;;  %v22_v19 = vld [vmem:[#allocation2] sm:$0xff]  ;;  %v23_v20 = vld [vmem:[#allocation2 + $0x8] sm:$0xff] }
   0xd   :  { %v121_v25 = vld [vmem:[%s240_s2] ss:$0 sm:$0xff] }
   0xe   :  { %48 = vmatpush.msra.mxu0 %v35_v7  ;;  %107 = vmatpush.msra.mxu1 %v35_v7 }
  0x10   :  { %49 = vmatpush.msra.mxu0 %v34_v8  ;;  %108 = vmatpush.msra.mxu1 %v34_v8 }
  0x12   :  { %50 = vmatpush.msra.mxu0 %v33_v9  ;;  %109 = vmatpush.msra.mxu1 %v33_v9 }
  0x14   :  { %51 = vmatpush.msra.mxu0 %v32_v10  ;;  %110 = vmatpush.msra.mxu1 %v32_v10 }
  0x16   :  { %52 = vmatpush.msra.mxu0 %v31_v11  ;;  %111 = vmatpush.msra.mxu1 %v31_v11 }
  0x18   :  { %53 = vmatpush.msra.mxu0 %v30_v12  ;;  %112 = vmatpush.msra.mxu1 %v30_v12 }
  0x1a   :  { %54 = vmatpush.msra.mxu0 %v29_v13  ;;  %113 = vmatpush.msra.mxu1 %v29_v13 }
  0x1c   :  { %55 = vmatpush.msra.mxu0 %v28_v14  ;;  %114 = vmatpush.msra.mxu1 %v28_v14 }
  0x1e   :  { %56 = vmatpush.msra.mxu0 %v27_v15  ;;  %115 = vmatpush.msra.mxu1 %v27_v15 }
  0x20   :  { %57 = vmatpush.msra.mxu0 %v26_v16  ;;  %116 = vmatpush.msra.mxu1 %v26_v16 }
  0x21   :  { %58 = vmatmul.f32.vlgmr.msra.gmra.mxu0 %v24_v17  ;;  %61 = vmatmul.f32.vlgmr.msra.gmra.mxu1 %v25_v18 }
  0x9e   :  { %v59_v21 = vpop.f32.mrf.mxu0  ;;  %v62_v22 = vpop.f32.mrf.mxu1 }
  0x9f   :  { %v65_v23 = vadd.f32 %v59_v21, %v22_v19  ;;  %v66_v24 = vadd.f32 %v62_v22, %v23_v20 }
  0xa1   :  { %68 = vst.msk [vmem:[#allocation2] sm:$0xff] %vm19_vm0, %v65_v23 }
  0xa2   :  { %69 = vst.msk [vmem:[#allocation2 + $0x8] sm:$0xff] %vm19_vm0, %v66_v24 }
  0xa8   :  { %v73_v26 = vld [vmem:[#allocation2] sm:$0xff] }
  0xa9   :  { %v74_v27 = vld [vmem:[#allocation2 + $0x8] sm:$0xff]  ;;  %v79_v28 = vadd.f32 %v121_v25, %v73_v26 }
  0xaa   :  { %v80_v29 = vadd.f32 %v121_v25, %v74_v27 }
  0xab   :  { %81 = vst.msk [vmem:[#allocation3] sm:$0xff] %vm19_vm0, %v79_v28 }
  0xac   :  { %82 = vst.msk [vmem:[#allocation3 + $0x8] sm:$0xff] %vm19_vm0, %v80_v29 }
  0xad   :  { %95 = dma.vmem_to_hbm [thread:$0]  %s88_s0, 256, %s90_s25, [#allocation4], %s150_s26, %s150_s26, %s151_s27  }
  0xae   :  { %146 = dma.done.wait [#allocation4], 256  }
  0xaf   :  { %147 = vsyncadd [#allocation4], 4294967040 }
  0xb0   :  { %100 = vsyncpa [#allocation4], 1 }

</bundles_post_ra>
